<compile_context>
chip_gen: v6e
topology: v6e:2x2x1
jax: 0.10.0
libtpu: 0.0.40
codegen_flags: <defaults>
</compile_context>

<pallas_src>
import jax
import jax.numpy as jnp
from jax.experimental import pallas as pl
from jax.experimental.pallas import tpu as pltpu

LANE = 128
MIN_TILE_B = 16                      # safe for bf16 (16,128) sublane packing
DEFAULT_VMEM_BUDGET = 48 << 20       # one config that fits v5e/v6e/v7x


def _round_up(x, m):
    return ((x + m - 1) // m) * m


def _layer_geometry(d_layers):
    n_layers = len(d_layers) - 1
    seg_widths = [int(d_layers[0])] + [int(h) for h in d_layers[1:-1]]
    seg_pad = [_round_up(w, LANE) for w in seg_widths]
    out_widths = [int(w) for w in d_layers[1:]]
    out_pad = [_round_up(w, LANE) for w in out_widths]
    cum_pad = [0]
    for p in seg_pad:
        cum_pad.append(cum_pad[-1] + p)
    return n_layers, seg_widths, seg_pad, out_widths, out_pad, cum_pad


def make_dense_nn_kernel(n_layers, cum_pad, slab_dtype):
    """Fused DenseNN body.

    Ref order: x_ref, (w_packed_0, b_0), ..., (w_packed_{L-1}, b_{L-1}), out_ref, slab_ref.
    w_packed_i : (cum_pad[i+1], out_pad[i]) — all preceding segments concatenated along K,
                 zero-padded rows/cols (padded rows multiply zero activation columns).
    b_i        : (1, out_pad[i]) f32.
    slab_ref   : VMEM scratch (tile_b, cum_pad[-1]) holding x + hidden activations,
                 every segment at a 128-aligned column offset.
    """

    def kernel(*refs):
        x_ref = refs[0]
        w_refs = [refs[1 + 2 * i] for i in range(n_layers)]
        b_refs = [refs[2 + 2 * i] for i in range(n_layers)]
        out_ref = refs[1 + 2 * n_layers]
        slab_ref = refs[2 + 2 * n_layers]

        # Segment 0 = lane-padded raw input (full, unmasked store).
        slab_ref[:, 0:cum_pad[1]] = x_ref[...].astype(slab_dtype)

        for i in range(n_layers):
            k_i = cum_pad[i + 1]
            # One consolidated MXU dot over every preceding segment (large K).
            z = jnp.dot(slab_ref[:, 0:k_i], w_refs[i][...],
                        preferred_element_type=jnp.float32)
            z = z + b_refs[i][...]                      # f32 bias add (VPU)
            if i != n_layers - 1:
                # f32 tanh (EUP); padded cols see tanh(0)=0 and only ever hit
                # zero-padded weight rows downstream -> no masking needed.
                slab_ref[:, cum_pad[i + 1]:cum_pad[i + 2]] = (
                    jnp.tanh(z).astype(slab_dtype))
            else:
                out_ref[...] = z.astype(out_ref.dtype)

    return kernel


def pack_dense_nn_params(weights, biases, d_layers, compute_dtype=jnp.bfloat16):
    """One-time packing: per-layer weight segments concatenated along K, zero-padded to
    lane-aligned (multiple-of-128) rows/cols; biases as (1, out_pad) f32 rows."""
    n_layers, seg_widths, seg_pad, out_widths, out_pad, cum = _layer_geometry(d_layers)
    packed_w, packed_b = [], []
    for i in range(n_layers):
        w = jnp.asarray(weights[i], jnp.float32)
        wp = jnp.zeros((cum[i + 1], out_pad[i]), jnp.float32)
        row_off = 0
        for j in range(i + 1):
            rows = seg_widths[j]
            wp = wp.at[cum[j]:cum[j] + rows, :out_widths[i]].set(
                w[row_off:row_off + rows, :])
            row_off += rows
        packed_w.append(wp.astype(compute_dtype))
        bp = jnp.zeros((1, out_pad[i]), jnp.float32)
        bp = bp.at[0, :out_widths[i]].set(jnp.asarray(biases[i], jnp.float32))
        packed_b.append(bp)
    return packed_w, packed_b


def dense_nn_forward_packed(x, packed_w, packed_b, d_layers, *, tile_b=None,
                            vmem_budget_bytes=DEFAULT_VMEM_BUDGET,
                            single_buffer_weights=True):
    """x: (B, d_in) f32; packed params from pack_dense_nn_params. Returns (B, d_out) f32."""
    n_layers, seg_widths, seg_pad, out_widths, out_pad, cum = _layer_geometry(d_layers)
    k_total = cum[-1]
    d_in, d_out = seg_widths[0], out_widths[-1]
    B = x.shape[0]
    slab_dtype = packed_w[0].dtype
    slab_item = jnp.dtype(slab_dtype).itemsize

    # ---- VMEM budgeting ----
    wbuf = 1 if single_buffer_weights else 2
    param_bytes = 0
    for w in packed_w:
        param_bytes += w.shape[0] * w.shape[1] * jnp.dtype(w.dtype).itemsize
    for b in packed_b:
        param_bytes += b.shape[0] * b.shape[1] * jnp.dtype(b.dtype).itemsize
    param_bytes *= wbuf
    # Per-batch-row residency: x block (f32, double-buffered) + activation slab
    # (single scratch) + out block (f32, double-buffered).
    bytes_per_row = 2 * seg_pad[0] * 4 + k_total * slab_item + 2 * out_pad[-1] * 4

    if tile_b is None:
        budget = max(vmem_budget_bytes - param_bytes - (4 << 20),
                     MIN_TILE_B * bytes_per_row)
        tile_b = budget // bytes_per_row
        tile_b = max(MIN_TILE_B, min(1024, (tile_b // MIN_TILE_B) * MIN_TILE_B))
        tile_b = min(tile_b, _round_up(B, MIN_TILE_B))
        # v7x megacore: keep >=2 grid steps along the parallel batch axis when possible.
        if _round_up(B, tile_b) // tile_b < 2 and B > MIN_TILE_B:
            tile_b = max(MIN_TILE_B, _round_up((B + 1) // 2, MIN_TILE_B))
    tile_b = max(MIN_TILE_B, _round_up(int(tile_b), MIN_TILE_B))
    b_pad = _round_up(B, tile_b)

    vmem_need = param_bytes + tile_b * bytes_per_row + (4 << 20)
    vmem_limit = int(min(max(vmem_need, 32 << 20), 64 << 20))

    # ---- pad input along batch/lanes (params are already packed) ----
    x_p = jnp.zeros((b_pad, seg_pad[0]), jnp.float32)
    x_p = x_p.at[:B, :d_in].set(x.astype(jnp.float32))

    kernel = make_dense_nn_kernel(n_layers, cum, slab_dtype)

    def _call(use_single_buffer):
        in_specs = [pl.BlockSpec((tile_b, seg_pad[0]), lambda i: (i, 0))]
        args = [x_p]
        for i in range(n_layers):
            if use_single_buffer:
                w_spec = pl.BlockSpec((cum[i + 1], out_pad[i]), lambda i_: (0, 0),
                                      pipeline_mode=pl.Buffered(1))
                b_spec = pl.BlockSpec((1, out_pad[i]), lambda i_: (0, 0),
                                      pipeline_mode=pl.Buffered(1))
            else:
                w_spec = pl.BlockSpec((cum[i + 1], out_pad[i]), lambda i_: (0, 0))
                b_spec = pl.BlockSpec((1, out_pad[i]), lambda i_: (0, 0))
            in_specs.append(w_spec)
            in_specs.append(b_spec)
            args.append(packed_w[i])
            args.append(packed_b[i])

        out = pl.pallas_call(
            kernel,
            out_shape=jax.ShapeDtypeStruct((b_pad, out_pad[-1]), jnp.float32),
            grid_spec=pltpu.PrefetchScalarGridSpec(
                num_scalar_prefetch=0,
                grid=(b_pad // tile_b,),
                in_specs=in_specs,
                out_specs=pl.BlockSpec((tile_b, out_pad[-1]), lambda i: (i, 0)),
                scratch_shapes=[pltpu.VMEM((tile_b, k_total), slab_dtype)],
            ),
            compiler_params=pltpu.CompilerParams(
                dimension_semantics=("parallel",),
                vmem_limit_bytes=vmem_limit),
        )(*args)
        return jax.block_until_ready(out)

    if single_buffer_weights:
        try:
            out_padded = _call(True)
        except Exception:
            # This jax build rejected Buffered(1); fall back to default pipelining.
            out_padded = _call(False)
    else:
        out_padded = _call(False)

    return out_padded[:B, :d_out]


def dense_nn_forward(x, weights, biases, d_layers, *, compute_dtype=jnp.bfloat16, **kw):
    """Convenience wrapper: packs params (prefer packing once at init) then runs."""
    pw, pb = pack_dense_nn_params(weights, biases, d_layers, compute_dtype=compute_dtype)
    return dense_nn_forward_packed(x, pw, pb, d_layers, **kw)


def dense_nn_reference(x, weights, biases, d_layers):
    """Pure-JAX reference matching the PyTorch forward semantics (tanh activation)."""
    n_layers = len(d_layers) - 1
    for i in range(n_layers):
        z = x @ weights[i] + biases[i]
        if i != n_layers - 1:
            x = jnp.concatenate([x, jnp.tanh(z)], axis=1)
        else:
            x = z
    return x


if __name__ == "__main__":
    # Small shapes consistent with the module: d_in=4, hidden=[32, 32], d_out=4, batch=8.
    d_in, hidden_sizes, d_out = 4, [32, 32], 4
    d_layers = [d_in] + hidden_sizes + [d_out]
    n_layers = len(hidden_sizes) + 1
    B = 8

    key = jax.random.PRNGKey(0)
    key, kx = jax.random.split(key)
    x = jax.random.normal(kx, (B, d_in), dtype=jnp.float32)

    # Deterministic parameter init (uniform, akin to nn.Linear default scale).
    weights, biases = [], []
    for i in range(n_layers):
        fan_in = int(sum(d_layers[: i + 1]))
        fan_out = int(d_layers[i + 1])
        bound = 1.0 / (fan_in ** 0.5)
        key, kw, kb = jax.random.split(key, 3)
        weights.append(jax.random.uniform(kw, (fan_in, fan_out), jnp.float32, -bound, bound))
        biases.append(jax.random.uniform(kb, (fan_out,), jnp.float32, -bound, bound))

    ref = dense_nn_reference(x, weights, biases, d_layers)

    # f32 operands (tight tolerance vs. the f32 reference).
    pw32, pb32 = pack_dense_nn_params(weights, biases, d_layers, compute_dtype=jnp.float32)
    out32 = dense_nn_forward_packed(x, pw32, pb32, d_layers)
    out32 = jax.block_until_ready(out32)
    assert out32.shape == (B, d_out)
    assert jnp.allclose(out32, ref, atol=3e-5, rtol=3e-5), "f32 mismatch vs reference"

    # Default bf16 matmul-operand path (f32 bias/tanh/accumulation), looser tolerance.
    pwbf, pbbf = pack_dense_nn_params(weights, biases, d_layers)  # bf16 default
    outbf = dense_nn_forward_packed(x, pwbf, pbbf, d_layers)
    outbf = jax.block_until_ready(outbf)
    assert outbf.shape == (B, d_out)
    assert jnp.allclose(outbf, ref, atol=5e-2, rtol=5e-2), "bf16 mismatch vs reference"

    print("KERNEL_OK")
</pallas_src>

<mosaic_0001>
module attributes {stable_mosaic.version = 11 : i64} {
  func.func @kernel(%arg0: i32, %arg1: memref<16x128xf32, #tpu.memory_space<vmem>>, %arg2: memref<128x128xf32, #tpu.memory_space<vmem>>, %arg3: memref<1x128xf32, #tpu.memory_space<vmem>>, %arg4: memref<256x128xf32, #tpu.memory_space<vmem>>, %arg5: memref<1x128xf32, #tpu.memory_space<vmem>>, %arg6: memref<384x128xf32, #tpu.memory_space<vmem>>, %arg7: memref<1x128xf32, #tpu.memory_space<vmem>>, %arg8: memref<16x128xf32, #tpu.memory_space<vmem>>, %arg9: memref<16x384xf32, #tpu.memory_space<vmem>>) attributes {dimension_semantics = [#tpu.dimension_semantics<parallel>], iteration_bounds = array<i64: 1>, scalar_prefetch = 0 : i64, scratch_operands = 1 : i64, tpu.core_type = #tpu.core_type<tc>, window_params = [{transform_indices = @transform_0, window_bounds = array<i64: 16, 128>}, {pipeline_mode = #tpu.pipeline_mode<synchronous>, transform_indices = @transform_1, window_bounds = array<i64: 128, 128>}, {pipeline_mode = #tpu.pipeline_mode<synchronous>, transform_indices = @transform_2, window_bounds = array<i64: 1, 128>}, {pipeline_mode = #tpu.pipeline_mode<synchronous>, transform_indices = @transform_3, window_bounds = array<i64: 256, 128>}, {pipeline_mode = #tpu.pipeline_mode<synchronous>, transform_indices = @transform_4, window_bounds = array<i64: 1, 128>}, {pipeline_mode = #tpu.pipeline_mode<synchronous>, transform_indices = @transform_5, window_bounds = array<i64: 384, 128>}, {pipeline_mode = #tpu.pipeline_mode<synchronous>, transform_indices = @transform_6, window_bounds = array<i64: 1, 128>}, {transform_indices = @transform_7, window_bounds = array<i64: 16, 128>}]} {
    %c0 = arith.constant 0 : index
    %c0_0 = arith.constant 0 : index
    %0 = vector.load %arg1[%c0, %c0_0] : memref<16x128xf32, #tpu.memory_space<vmem>>, vector<16x128xf32>
    %c0_1 = arith.constant 0 : index
    %c0_2 = arith.constant 0 : index
    %1 = vector.load %arg9[%c0_1, %c0_2] : memref<16x384xf32, #tpu.memory_space<vmem>>, vector<16x128xf32>
    tpu.vector_store %arg9[%c0_1, %c0_2], %0 {strides = array<i32>} : memref<16x384xf32, #tpu.memory_space<vmem>>, vector<16x128xf32>,
    %c0_3 = arith.constant 0 : index
    %c0_4 = arith.constant 0 : index
    %2 = vector.load %arg9[%c0_3, %c0_4] : memref<16x384xf32, #tpu.memory_space<vmem>>, vector<16x128xf32>
    %c0_5 = arith.constant 0 : index
    %c0_6 = arith.constant 0 : index
    %3 = vector.load %arg2[%c0_5, %c0_6] : memref<128x128xf32, #tpu.memory_space<vmem>>, vector<128x128xf32>
    %cst = arith.constant dense<0.000000e+00> : vector<16x128xf32>
    %4 = tpu.matmul %2, %3, %cst {dimension_numbers = #tpu.dot_dimension_numbers<[1], [0], [0], [1], [0, 0, 1, 1], [], []>} : vector<16x128xf32>, vector<128x128xf32>, vector<16x128xf32> -> vector<16x128xf32>
    %c0_7 = arith.constant 0 : index
    %c0_8 = arith.constant 0 : index
    %5 = vector.load %arg3[%c0_7, %c0_8] : memref<1x128xf32, #tpu.memory_space<vmem>>, vector<1x128xf32>
    %6 = vector.broadcast %5 : vector<1x128xf32> to vector<16x128xf32>
    %7 = arith.addf %4, %6 : vector<16x128xf32>
    %8 = math.tanh %7 : vector<16x128xf32>
    %c0_9 = arith.constant 0 : index
    %c128 = arith.constant 128 : index
    %9 = vector.load %arg9[%c0_9, %c128] : memref<16x384xf32, #tpu.memory_space<vmem>>, vector<16x128xf32>
    tpu.vector_store %arg9[%c0_9, %c128], %8 {strides = array<i32>} : memref<16x384xf32, #tpu.memory_space<vmem>>, vector<16x128xf32>,
    %c0_10 = arith.constant 0 : index
    %c0_11 = arith.constant 0 : index
    %10 = vector.load %arg9[%c0_10, %c0_11] : memref<16x384xf32, #tpu.memory_space<vmem>>, vector<16x256xf32>
    %c0_12 = arith.constant 0 : index
    %c0_13 = arith.constant 0 : index
    %11 = vector.load %arg4[%c0_12, %c0_13] : memref<256x128xf32, #tpu.memory_space<vmem>>, vector<256x128xf32>
    %cst_14 = arith.constant dense<0.000000e+00> : vector<16x128xf32>
    %12 = tpu.matmul %10, %11, %cst_14 {dimension_numbers = #tpu.dot_dimension_numbers<[1], [0], [0], [1], [0, 0, 1, 1], [], []>} : vector<16x256xf32>, vector<256x128xf32>, vector<16x128xf32> -> vector<16x128xf32>
    %c0_15 = arith.constant 0 : index
    %c0_16 = arith.constant 0 : index
    %13 = vector.load %arg5[%c0_15, %c0_16] : memref<1x128xf32, #tpu.memory_space<vmem>>, vector<1x128xf32>
    %14 = vector.broadcast %13 : vector<1x128xf32> to vector<16x128xf32>
    %15 = arith.addf %12, %14 : vector<16x128xf32>
    %16 = math.tanh %15 : vector<16x128xf32>
    %c0_17 = arith.constant 0 : index
    %c256 = arith.constant 256 : index
    %17 = vector.load %arg9[%c0_17, %c256] : memref<16x384xf32, #tpu.memory_space<vmem>>, vector<16x128xf32>
    tpu.vector_store %arg9[%c0_17, %c256], %16 {strides = array<i32>} : memref<16x384xf32, #tpu.memory_space<vmem>>, vector<16x128xf32>,
    %c0_18 = arith.constant 0 : index
    %c0_19 = arith.constant 0 : index
    %18 = vector.load %arg9[%c0_18, %c0_19] : memref<16x384xf32, #tpu.memory_space<vmem>>, vector<16x384xf32>
    %c0_20 = arith.constant 0 : index
    %c0_21 = arith.constant 0 : index
    %19 = vector.load %arg6[%c0_20, %c0_21] : memref<384x128xf32, #tpu.memory_space<vmem>>, vector<384x128xf32>
    %cst_22 = arith.constant dense<0.000000e+00> : vector<16x128xf32>
    %20 = tpu.matmul %18, %19, %cst_22 {dimension_numbers = #tpu.dot_dimension_numbers<[1], [0], [0], [1], [0, 0, 1, 1], [], []>} : vector<16x384xf32>, vector<384x128xf32>, vector<16x128xf32> -> vector<16x128xf32>
    %c0_23 = arith.constant 0 : index
    %c0_24 = arith.constant 0 : index
    %21 = vector.load %arg7[%c0_23, %c0_24] : memref<1x128xf32, #tpu.memory_space<vmem>>, vector<1x128xf32>
    %22 = vector.broadcast %21 : vector<1x128xf32> to vector<16x128xf32>
    %23 = arith.addf %20, %22 : vector<16x128xf32>
    %c0_25 = arith.constant 0 : index
    %c0_26 = arith.constant 0 : index
    %24 = vector.load %arg8[%c0_25, %c0_26] : memref<16x128xf32, #tpu.memory_space<vmem>>, vector<16x128xf32>
    tpu.vector_store %arg8[%c0_25, %c0_26], %23 {strides = array<i32>} : memref<16x128xf32, #tpu.memory_space<vmem>>, vector<16x128xf32>,
    return
  }
  func.func @transform_0(%arg0: i32) -> (i32, i32) {
    %c0_i32 = arith.constant 0 : i32
    %c0_i32_0 = arith.constant 0 : i32
    return %arg0, %c0_i32 : i32, i32
  }
  func.func @transform_1(%arg0: i32) -> (i32, i32) {
    %c0_i32 = arith.constant 0 : i32
    %c0_i32_0 = arith.constant 0 : i32
    %c0_i32_1 = arith.constant 0 : i32
    return %c0_i32, %c0_i32_0 : i32, i32
  }
  func.func @transform_2(%arg0: i32) -> (i32, i32) {
    %c0_i32 = arith.constant 0 : i32
    %c0_i32_0 = arith.constant 0 : i32
    %c0_i32_1 = arith.constant 0 : i32
    return %c0_i32, %c0_i32_0 : i32, i32
  }
  func.func @transform_3(%arg0: i32) -> (i32, i32) {
    %c0_i32 = arith.constant 0 : i32
    %c0_i32_0 = arith.constant 0 : i32
    %c0_i32_1 = arith.constant 0 : i32
    return %c0_i32, %c0_i32_0 : i32, i32
  }
  func.func @transform_4(%arg0: i32) -> (i32, i32) {
    %c0_i32 = arith.constant 0 : i32
    %c0_i32_0 = arith.constant 0 : i32
    %c0_i32_1 = arith.constant 0 : i32
    return %c0_i32, %c0_i32_0 : i32, i32
  }
  func.func @transform_5(%arg0: i32) -> (i32, i32) {
    %c0_i32 = arith.constant 0 : i32
    %c0_i32_0 = arith.constant 0 : i32
    %c0_i32_1 = arith.constant 0 : i32
    return %c0_i32, %c0_i32_0 : i32, i32
  }
  func.func @transform_6(%arg0: i32) -> (i32, i32) {
    %c0_i32 = arith.constant 0 : i32
    %c0_i32_0 = arith.constant 0 : i32
    %c0_i32_1 = arith.constant 0 : i32
    return %c0_i32, %c0_i32_0 : i32, i32
  }
  func.func @transform_7(%arg0: i32) -> (i32, i32) {
    %c0_i32 = arith.constant 0 : i32
    %c0_i32_0 = arith.constant 0 : i32
    return %arg0, %c0_i32 : i32, i32
  }
}

module attributes {stable_mosaic.version = 11 : i64} {
  func.func @kernel(%arg0: i32, %arg1: memref<16x128xf32, #tpu.memory_space<vmem>>, %arg2: memref<128x128xf32, #tpu.memory_space<vmem>>, %arg3: memref<1x128xf32, #tpu.memory_space<vmem>>, %arg4: memref<256x128xf32, #tpu.memory_space<vmem>>, %arg5: memref<1x128xf32, #tpu.memory_space<vmem>>, %arg6: memref<384x128xf32, #tpu.memory_space<vmem>>, %arg7: memref<1x128xf32, #tpu.memory_space<vmem>>, %arg8: memref<16x128xf32, #tpu.memory_space<vmem>>, %arg9: memref<16x384xf32, #tpu.memory_space<vmem>>) attributes {dimension_semantics = [#tpu.dimension_semantics<parallel>], iteration_bounds = array<i64: 1>, scalar_prefetch = 0 : i64, scratch_operands = 1 : i64, tpu.core_type = #tpu.core_type<tc>, window_params = [{transform_indices = @transform_0, window_bounds = array<i64: 16, 128>}, {pipeline_mode = #tpu.pipeline_mode<synchronous>, transform_indices = @transform_1, window_bounds = array<i64: 128, 128>}, {pipeline_mode = #tpu.pipeline_mode<synchronous>, transform_indices = @transform_2, window_bounds = array<i64: 1, 128>}, {pipeline_mode = #tpu.pipeline_mode<synchronous>, transform_indices = @transform_3, window_bounds = array<i64: 256, 128>}, {pipeline_mode = #tpu.pipeline_mode<synchronous>, transform_indices = @transform_4, window_bounds = array<i64: 1, 128>}, {pipeline_mode = #tpu.pipeline_mode<synchronous>, transform_indices = @transform_5, window_bounds = array<i64: 384, 128>}, {pipeline_mode = #tpu.pipeline_mode<synchronous>, transform_indices = @transform_6, window_bounds = array<i64: 1, 128>}, {transform_indices = @transform_7, window_bounds = array<i64: 16, 128>}]} {
    %c0 = arith.constant 0 : index
    %c0_0 = arith.constant 0 : index
    %0 = vector.load %arg1[%c0, %c0_0] : memref<16x128xf32, #tpu.memory_space<vmem>>, vector<16x128xf32>
    %c0_1 = arith.constant 0 : index
    %c0_2 = arith.constant 0 : index
    %1 = vector.load %arg9[%c0_1, %c0_2] : memref<16x384xf32, #tpu.memory_space<vmem>>, vector<16x128xf32>
    tpu.vector_store %arg9[%c0_1, %c0_2], %0 {strides = array<i32>} : memref<16x384xf32, #tpu.memory_space<vmem>>, vector<16x128xf32>,
    %c0_3 = arith.constant 0 : index
    %c0_4 = arith.constant 0 : index
    %2 = vector.load %arg9[%c0_3, %c0_4] : memref<16x384xf32, #tpu.memory_space<vmem>>, vector<16x128xf32>
    %c0_5 = arith.constant 0 : index
    %c0_6 = arith.constant 0 : index
    %3 = vector.load %arg2[%c0_5, %c0_6] : memref<128x128xf32, #tpu.memory_space<vmem>>, vector<128x128xf32>
    %cst = arith.constant dense<0.000000e+00> : vector<16x128xf32>
    %4 = tpu.matmul %2, %3, %cst {dimension_numbers = #tpu.dot_dimension_numbers<[1], [0], [0], [1], [0, 0, 1, 1], [], []>} : vector<16x128xf32>, vector<128x128xf32>, vector<16x128xf32> -> vector<16x128xf32>
    %c0_7 = arith.constant 0 : index
    %c0_8 = arith.constant 0 : index
    %5 = vector.load %arg3[%c0_7, %c0_8] : memref<1x128xf32, #tpu.memory_space<vmem>>, vector<1x128xf32>
    %6 = vector.broadcast %5 : vector<1x128xf32> to vector<16x128xf32>
    %7 = arith.addf %4, %6 : vector<16x128xf32>
    %8 = math.tanh %7 : vector<16x128xf32>
    %c0_9 = arith.constant 0 : index
    %c128 = arith.constant 128 : index
    %9 = vector.load %arg9[%c0_9, %c128] : memref<16x384xf32, #tpu.memory_space<vmem>>, vector<16x128xf32>
    tpu.vector_store %arg9[%c0_9, %c128], %8 {strides = array<i32>} : memref<16x384xf32, #tpu.memory_space<vmem>>, vector<16x128xf32>,
    %c0_10 = arith.constant 0 : index
    %c0_11 = arith.constant 0 : index
    %10 = vector.load %arg9[%c0_10, %c0_11] : memref<16x384xf32, #tpu.memory_space<vmem>>, vector<16x256xf32>
    %c0_12 = arith.constant 0 : index
    %c0_13 = arith.constant 0 : index
    %11 = vector.load %arg4[%c0_12, %c0_13] : memref<256x128xf32, #tpu.memory_space<vmem>>, vector<256x128xf32>
    %cst_14 = arith.constant dense<0.000000e+00> : vector<16x128xf32>
    %12 = tpu.matmul %10, %11, %cst_14 {dimension_numbers = #tpu.dot_dimension_numbers<[1], [0], [0], [1], [0, 0, 1, 1], [], []>} : vector<16x256xf32>, vector<256x128xf32>, vector<16x128xf32> -> vector<16x128xf32>
    %c0_15 = arith.constant 0 : index
    %c0_16 = arith.constant 0 : index
    %13 = vector.load %arg5[%c0_15, %c0_16] : memref<1x128xf32, #tpu.memory_space<vmem>>, vector<1x128xf32>
    %14 = vector.broadcast %13 : vector<1x128xf32> to vector<16x128xf32>
    %15 = arith.addf %12, %14 : vector<16x128xf32>
    %16 = math.tanh %15 : vector<16x128xf32>
    %c0_17 = arith.constant 0 : index
    %c256 = arith.constant 256 : index
    %17 = vector.load %arg9[%c0_17, %c256] : memref<16x384xf32, #tpu.memory_space<vmem>>, vector<16x128xf32>
    tpu.vector_store %arg9[%c0_17, %c256], %16 {strides = array<i32>} : memref<16x384xf32, #tpu.memory_space<vmem>>, vector<16x128xf32>,
    %c0_18 = arith.constant 0 : index
    %c0_19 = arith.constant 0 : index
    %18 = vector.load %arg9[%c0_18, %c0_19] : memref<16x384xf32, #tpu.memory_space<vmem>>, vector<16x384xf32>
    %c0_20 = arith.constant 0 : index
    %c0_21 = arith.constant 0 : index
    %19 = vector.load %arg6[%c0_20, %c0_21] : memref<384x128xf32, #tpu.memory_space<vmem>>, vector<384x128xf32>
    %cst_22 = arith.constant dense<0.000000e+00> : vector<16x128xf32>
    %20 = tpu.matmul %18, %19, %cst_22 {dimension_numbers = #tpu.dot_dimension_numbers<[1], [0], [0], [1], [0, 0, 1, 1], [], []>} : vector<16x384xf32>, vector<384x128xf32>, vector<16x128xf32> -> vector<16x128xf32>
    %c0_23 = arith.constant 0 : index
    %c0_24 = arith.constant 0 : index
    %21 = vector.load %arg7[%c0_23, %c0_24] : memref<1x128xf32, #tpu.memory_space<vmem>>, vector<1x128xf32>
    %22 = vector.broadcast %21 : vector<1x128xf32> to vector<16x128xf32>
    %23 = arith.addf %20, %22 : vector<16x128xf32>
    %c0_25 = arith.constant 0 : index
    %c0_26 = arith.constant 0 : index
    %24 = vector.load %arg8[%c0_25, %c0_26] : memref<16x128xf32, #tpu.memory_space<vmem>>, vector<16x128xf32>
    tpu.vector_store %arg8[%c0_25, %c0_26], %23 {strides = array<i32>} : memref<16x128xf32, #tpu.memory_space<vmem>>, vector<16x128xf32>,
    return
  }
  func.func @transform_0(%arg0: i32) -> (i32, i32) {
    %c0_i32 = arith.constant 0 : i32
    %c0_i32_0 = arith.constant 0 : i32
    return %arg0, %c0_i32 : i32, i32
  }
  func.func @transform_1(%arg0: i32) -> (i32, i32) {
    %c0_i32 = arith.constant 0 : i32
    %c0_i32_0 = arith.constant 0 : i32
    %c0_i32_1 = arith.constant 0 : i32
    return %c0_i32, %c0_i32_0 : i32, i32
  }
  func.func @transform_2(%arg0: i32) -> (i32, i32) {
    %c0_i32 = arith.constant 0 : i32
    %c0_i32_0 = arith.constant 0 : i32
    %c0_i32_1 = arith.constant 0 : i32
    return %c0_i32, %c0_i32_0 : i32, i32
  }
  func.func @transform_3(%arg0: i32) -> (i32, i32) {
    %c0_i32 = arith.constant 0 : i32
    %c0_i32_0 = arith.constant 0 : i32
    %c0_i32_1 = arith.constant 0 : i32
    return %c0_i32, %c0_i32_0 : i32, i32
  }
  func.func @transform_4(%arg0: i32) -> (i32, i32) {
    %c0_i32 = arith.constant 0 : i32
    %c0_i32_0 = arith.constant 0 : i32
    %c0_i32_1 = arith.constant 0 : i32
    return %c0_i32, %c0_i32_0 : i32, i32
  }
  func.func @transform_5(%arg0: i32) -> (i32, i32) {
    %c0_i32 = arith.constant 0 : i32
    %c0_i32_0 = arith.constant 0 : i32
    %c0_i32_1 = arith.constant 0 : i32
    return %c0_i32, %c0_i32_0 : i32, i32
  }
  func.func @transform_6(%arg0: i32) -> (i32, i32) {
    %c0_i32 = arith.constant 0 : i32
    %c0_i32_0 = arith.constant 0 : i32
    %c0_i32_1 = arith.constant 0 : i32
    return %c0_i32, %c0_i32_0 : i32, i32
  }
  func.func @transform_7(%arg0: i32) -> (i32, i32) {
    %c0_i32 = arith.constant 0 : i32
    %c0_i32_0 = arith.constant 0 : i32
    return %arg0, %c0_i32 : i32, i32
  }
}

</mosaic_0001>

<bundles_post_ra>
// kernel: tpu_custom_call.1
= control target key start
LH: loop header
LB: loop body
LE: loop exit
PB: predicated region body
PF: predicated region fallthrough
CT: control target
= control target key end

     0   :  { %12 = vsyncpa [#allocation4], 0  ;;  %s948_s0 = inlined_call_operand.hbm [shape: f32[16,128], index: 0, kind: input, shape index: {}]   ;;  %s949_s1 = inlined_call_operand.hbm [shape: f32[128,128], index: 1, kind: input, shape index: {}]   ;;  %s950_s2 = inlined_call_operand.vmem [shape: f32[1,128], index: 2, kind: input, shape index: {}]   ;;  %s951_s3 = inlined_call_operand.hbm [shape: f32[256,128], index: 3, kind: input, shape index: {}]   ;;  %s952_s4 = inlined_call_operand.vmem [shape: f32[1,128], index: 4, kind: input, shape index: {}]   ;;  %s953_s5 = inlined_call_operand.hbm [shape: f32[384,128], index: 5, kind: input, shape index: {}]   ;;  %s954_s6 = inlined_call_operand.vmem [shape: f32[1,128], index: 6, kind: input, shape index: {}]   ;;  %s955_s7 = inlined_call_operand.hbm [shape: f32[16,128], index: 7, kind: output, shape index: {}]  }
   0x1   :  { %13 = vsyncpa [#allocation7], 0 }
   0x2   :  { %14 = vsyncpa [#allocation10], 0 }
   0x3   :  { %15 = vsyncpa [#allocation5], 0  ;;  %s852_s24 = smov [#allocation6]   ;;  %s853_s26 = smov [#allocation3]  }
   0x4   :  { %s33_s25 = sshll.u32 %s852_s24, 4  ;;  %s21_s27 = sshll.u32 %s853_s26, 4  ;;  %s34_s25 = int_to_ptr.vmem [resolvable:$true] %s33_s25  ;;  %s22_s27 = int_to_ptr.vmem [resolvable:$true] %s21_s27 }
   0x5   :  { %s752_s28 = scalar_lea.vmem %s34_s25, 2048  ;;  %p757_p1 = scmp.lt.s32.totalorder %s34_s25, %s34_s25 }
   0x6   :  { %p753_p0 = scmp.ne.s32.totalorder %s34_s25, %s752_s28  ;;  %p758_p2 = scmp.lt.s32.totalorder %s752_s28, %s752_s28 }
   0x8   :  { %p759_p3 = por %p758_p2, %p757_p1 }
   0xa   :  { %p760_p4 = pnand %p759_p3, %p753_p0 }
   0xc   :  { %763 = shalt.err (!%p760_p4)
}
   0xd   :  { %s854_s29 = smov 128   ;;  %s855_s30 = smov 8  }
   0xe   :  { %39 = dma.hbm_to_vmem [thread:$0]  %s949_s1, 2048, %s34_s25, [#allocation7], %s854_s29, %s854_s29, %s855_s30  }
   0xf   :  { %s772_s10 = scalar_lea.vmem %s22_s27, 256  ;;  %p777_p6 = scmp.lt.s32.totalorder %s22_s27, %s22_s27 }
  0x10   :  { %p773_p5 = scmp.ne.s32.totalorder %s22_s27, %s772_s10  ;;  %p778_p7 = scmp.lt.s32.totalorder %s772_s10, %s772_s10 }
  0x12   :  { %p779_p8 = por %p778_p7, %p777_p6 }
  0x14   :  { %p780_p9 = pnand %p779_p8, %p773_p5 }
  0x16   :  { %783 = shalt.err (!%p780_p9)
}
  0x17   :  { %27 = dma.hbm_to_vmem [thread:$0]  %s948_s0, 256, %s22_s27, [#allocation4], %s854_s29, %s854_s29, %s855_s30  }
  0x18   :  { %s856_s13 = smov [#allocation8]   ;;  %s857_s15 = smov [#allocation9]  }
  0x19   :  { %s47_s14 = sshll.u32 %s856_s13, 4  ;;  %s61_s16 = sshll.u32 %s857_s15, 4  ;;  %s48_s14 = int_to_ptr.vmem [resolvable:$true] %s47_s14  ;;  %s62_s16 = int_to_ptr.vmem [resolvable:$true] %s61_s16 }
  0x1a   :  { %s792_s1 = scalar_lea.vmem %s48_s14, 4096  ;;  %p797_p11 = scmp.lt.s32.totalorder %s48_s14, %s48_s14 }
  0x1b   :  { %p793_p10 = scmp.ne.s32.totalorder %s48_s14, %s792_s1  ;;  %p798_p12 = scmp.lt.s32.totalorder %s792_s1, %s792_s1 }
  0x1d   :  { %p799_p13 = por %p798_p12, %p797_p11 }
  0x1f   :  { %p800_p0 = pnand %p799_p13, %p793_p10 }
  0x21   :  { %803 = shalt.err (!%p800_p0)
}
  0x22   :  { %53 = dma.hbm_to_vmem [thread:$0]  %s951_s3, 4096, %s48_s14, [#allocation7], %s854_s29, %s854_s29, %s855_s30  }
  0x23   :  { %s812_s0 = scalar_lea.vmem %s62_s16, 6144  ;;  %p817_p2 = scmp.lt.s32.totalorder %s62_s16, %s62_s16 }
  0x24   :  { %p813_p1 = scmp.ne.s32.totalorder %s62_s16, %s812_s0  ;;  %p818_p3 = scmp.lt.s32.totalorder %s812_s0, %s812_s0 }
  0x26   :  { %p819_p4 = por %p818_p3, %p817_p2 }
  0x28   :  { %p820_p5 = pnand %p819_p4, %p813_p1 }
  0x2a   :  { %823 = shalt.err (!%p820_p5)
}
  0x2b   :  { %67 = dma.hbm_to_vmem [thread:$0]  %s953_s5, 6144, %s62_s16, [#allocation10], %s854_s29, %s854_s29, %s855_s30  }
  0x2c   :  { %844 = dma.done.wait [#allocation4], 256  }
  0x2d   :  { %845 = vsyncadd [#allocation4], 4294967040 }
  0x2e   :  { %846 = dma.done.wait [#allocation7], 6144  }
  0x2f   :  { %847 = vsyncadd [#allocation7], 4294961152 }
  0x30   :  { %848 = dma.done.wait [#allocation10], 6144  }
  0x31   :  { %849 = vsyncadd [#allocation10], 4294961152  ;;  %v103_v0 = vld [vmem:[#allocation6 + $0x78] sm:$0xff]  ;;  %v102_v1 = vld [vmem:[#allocation6 + $0x70] sm:$0xff]  ;;  %s858_s23 = smov [#allocation11]  }
  0x32   :  { %659 = vmatprep.subr.mxu0 %v103_v0  ;;  %v101_v2 = vld [vmem:[#allocation6 + $0x68] sm:$0xff]  ;;  %v100_v3 = vld [vmem:[#allocation6 + $0x60] sm:$0xff]  ;;  %v923_v4 = vld [vmem:[#allocation3] sm:$0xff]  ;;  %s530_s24 = sshll.u32 %s858_s23, 4  ;;  %s531_s24 = int_to_ptr.vmem [resolvable:$true] %s530_s24 }
  0x33   :  { %660 = vmatpush3.msra.mxu0 %v103_v0  ;;  %v99_v5 = vld [vmem:[#allocation6 + $0x58] sm:$0xff]  ;;  %691 = vmatprep.mubr.f32.mxu0 %v923_v4  ;;  %v224_v8 = vld [vmem:[#allocation8 + $0xf0] sm:$0xff]  ;;  %v223_v11 = vld [vmem:[#allocation8 + $0xe8] sm:$0xff]  ;;  %s824_s25 = scalar_lea.vmem %s531_s24, 256  ;;  %p829_p7 = scmp.lt.s32.totalorder %s531_s24, %s531_s24 }
  0x34   :  { %661 = vmatprep.subr.mxu0 %v102_v1  ;;  %v225_v6 = vld [vmem:[#allocation8 + $0xf8] sm:$0xff]  ;;  %v98_v9 = vld [vmem:[#allocation6 + $0x50] sm:$0xff]  ;;  %v207_v12 = vld [vmem:[#allocation8 + $0x68] sm:$0xff]  ;;  %p825_p6 = scmp.ne.s32.totalorder %s531_s24, %s824_s25  ;;  %p830_p8 = scmp.lt.s32.totalorder %s824_s25, %s824_s25 }
  0x35   :  { %662 = vmatpush3.msra.mxu0 %v102_v1  ;;  %v209_v7 = vld [vmem:[#allocation8 + $0x78] sm:$0xff]  ;;  %565 = vmatprep.subr.mxu1 %v225_v6  ;;  %v208_v10 = vld [vmem:[#allocation8 + $0x70] sm:$0xff]  ;;  %v97_v13 = vld [vmem:[#allocation6 + $0x48] sm:$0xff] }
  0x36   :  { %663 = vmatprep.subr.mxu0 %v101_v2  ;;  %566 = vmatpush3.msra.mxu1 %v209_v7  ;;  %v222_v14 = vld [vmem:[#allocation8 + $0xe0] sm:$0xff]  ;;  %v221_v17 = vld [vmem:[#allocation8 + $0xd8] sm:$0xff]  ;;  %v220_v20 = vld [vmem:[#allocation8 + $0xd0] sm:$0xff]  ;;  %p831_p9 = por %p830_p8, %p829_p7 }
  0x37   :  { %664 = vmatpush3.msra.mxu0 %v101_v2  ;;  %567 = vmatprep.subr.mxu1 %v224_v8  ;;  %v206_v15 = vld [vmem:[#allocation8 + $0x60] sm:$0xff]  ;;  %v205_v18 = vld [vmem:[#allocation8 + $0x58] sm:$0xff]  ;;  %v204_v21 = vld [vmem:[#allocation8 + $0x50] sm:$0xff] }
  0x38   :  { %665 = vmatprep.subr.mxu0 %v100_v3  ;;  %568 = vmatpush3.msra.mxu1 %v208_v10  ;;  %v96_v16 = vld [vmem:[#allocation6 + $0x40] sm:$0xff]  ;;  %v95_v19 = vld [vmem:[#allocation6 + $0x38] sm:$0xff]  ;;  %v94_v22 = vld [vmem:[#allocation6 + $0x30] sm:$0xff]  ;;  %p832_p10 = pnand %p831_p9, %p825_p6 }
  0x39   :  { %666 = vmatpush3.msra.mxu0 %v100_v3  ;;  %569 = vmatprep.subr.mxu1 %v223_v11  ;;  %v93_v23 = vld [vmem:[#allocation6 + $0x28] sm:$0xff]  ;;  %v92_v24 = vld [vmem:[#allocation6 + $0x20] sm:$0xff]  ;;  %v91_v25 = vld [vmem:[#allocation6 + $0x18] sm:$0xff] }
  0x3a   :  { %667 = vmatprep.subr.mxu0 %v99_v5  ;;  %570 = vmatpush3.msra.mxu1 %v207_v12  ;;  %v90_v26 = vld [vmem:[#allocation6 + $0x10] sm:$0xff]  ;;  %v89_v27 = vld [vmem:[#allocation6 + $0x8] sm:$0xff]  ;;  %v88_v28 = vld [vmem:[#allocation6] sm:$0xff] }
  0x3b   :  { %668 = vmatpush3.msra.mxu0 %v99_v5  ;;  %571 = vmatprep.subr.mxu1 %v222_v14  ;;  %v926_v29 = vld [vmem:[#allocation3 + $0x8] sm:$0xff]  ;;  %v348_v32 = vld [vmem:[#allocation9 + $0xf0] sm:$0xff]  ;;  %v347_v34 = vld [vmem:[#allocation9 + $0xe8] sm:$0xff] }
  0x3c   :  { %669 = vmatprep.subr.mxu0 %v98_v9  ;;  %572 = vmatpush3.msra.mxu1 %v206_v15  ;;  %v349_v30 = vld [vmem:[#allocation9 + $0xf8] sm:$0xff]  ;;  %v332_v33 = vld [vmem:[#allocation9 + $0x70] sm:$0xff]  ;;  %v331_v35 = vld [vmem:[#allocation9 + $0x68] sm:$0xff] }
  0x3d   :  { %670 = vmatpush3.msra.mxu0 %v98_v9  ;;  %573 = vmatprep.subr.mxu1 %v221_v17  ;;  %v333_v31 = vld [vmem:[#allocation9 + $0x78] sm:$0xff]  ;;  %v346_v36 = vld [vmem:[#allocation9 + $0xe0] sm:$0xff]  ;;  %v344_v40 = vld [vmem:[#allocation9 + $0xd0] sm:$0xff] }
  0x3e   :  { %671 = vmatprep.subr.mxu0 %v97_v13  ;;  %574 = vmatpush3.msra.mxu1 %v205_v18  ;;  %v330_v37 = vld [vmem:[#allocation9 + $0x60] sm:$0xff]  ;;  %v345_v38 = vld [vmem:[#allocation9 + $0xd8] sm:$0xff]  ;;  %v328_v41 = vld [vmem:[#allocation9 + $0x50] sm:$0xff] }
  0x3f   :  { %672 = vmatpush3.msra.mxu0 %v97_v13  ;;  %575 = vmatprep.subr.mxu1 %v220_v20  ;;  %v329_v39 = vld [vmem:[#allocation9 + $0x58] sm:$0xff]  ;;  %v219_v42 = vld [vmem:[#allocation8 + $0xc8] sm:$0xff]  ;;  %v218_v46 = vld [vmem:[#allocation8 + $0xc0] sm:$0xff] }
  0x40   :  { %673 = vmatprep.subr.mxu0 %v96_v16  ;;  %576 = vmatpush3.msra.mxu1 %v204_v21  ;;  %v343_v43 = vld [vmem:[#allocation9 + $0xc8] sm:$0xff]  ;;  %v342_v47 = vld [vmem:[#allocation9 + $0xc0] sm:$0xff]  ;;  %v217_v50 = vld [vmem:[#allocation8 + $0xb8] sm:$0xff] }
  0x41   :  { %674 = vmatpush3.msra.mxu0 %v96_v16  ;;  %577 = vmatprep.subr.mxu1 %v219_v42  ;;  %v203_v44 = vld [vmem:[#allocation8 + $0x48] sm:$0xff]  ;;  %v202_v48 = vld [vmem:[#allocation8 + $0x40] sm:$0xff]  ;;  %v341_v51 = vld [vmem:[#allocation9 + $0xb8] sm:$0xff] }
  0x42   :  { %675 = vmatprep.subr.mxu0 %v95_v19  ;;  %v327_v45 = vld [vmem:[#allocation9 + $0x48] sm:$0xff]  ;;  %578 = vmatpush3.msra.mxu1 %v203_v44  ;;  %v326_v49 = vld [vmem:[#allocation9 + $0x40] sm:$0xff]  ;;  %v201_v52 = vld [vmem:[#allocation8 + $0x38] sm:$0xff] }
  0x43   :  { %676 = vmatpush3.msra.mxu0 %v95_v19  ;;  %579 = vmatprep.subr.mxu1 %v218_v46  ;;  %v325_v53 = vld [vmem:[#allocation9 + $0x38] sm:$0xff]  ;;  %v216_v54 = vld [vmem:[#allocation8 + $0xb0] sm:$0xff]  ;;  %v215_v58 = vld [vmem:[#allocation8 + $0xa8] sm:$0xff] }
  0x44   :  { %677 = vmatprep.subr.mxu0 %v94_v22  ;;  %580 = vmatpush3.msra.mxu1 %v202_v48  ;;  %v340_v55 = vld [vmem:[#allocation9 + $0xb0] sm:$0xff]  ;;  %v339_v59 = vld [vmem:[#allocation9 + $0xa8] sm:$0xff]  ;;  %v214_v62 = vld [vmem:[#allocation8 + $0xa0] sm:$0xff] }
  0x45   :  { %678 = vmatpush3.msra.mxu0 %v94_v22  ;;  %581 = vmatprep.subr.mxu1 %v217_v50  ;;  %v200_v56 = vld [vmem:[#allocation8 + $0x30] sm:$0xff]  ;;  %v199_v60 = vld [vmem:[#allocation8 + $0x28] sm:$0xff]  ;;  %v338_v63 = vld [vmem:[#allocation9 + $0xa0] sm:$0xff] }
  0x46   :  { %679 = vmatprep.subr.mxu0 %v93_v23  ;;  %582 = vmatpush3.msra.mxu1 %v201_v52  ;;  %v324_v57 = vld [vmem:[#allocation9 + $0x30] sm:$0xff]  ;;  %v323_v61 = vld [vmem:[#allocation9 + $0x28] sm:$0xff]  ;;  %v198_v0 = vld [vmem:[#allocation8 + $0x20] sm:$0xff] }
  0x47   :  { %680 = vmatpush3.msra.mxu0 %v93_v23  ;;  %583 = vmatprep.subr.mxu1 %v216_v54  ;;  %v322_v1 = vld [vmem:[#allocation9 + $0x20] sm:$0xff]  ;;  %v213_v2 = vld [vmem:[#allocation8 + $0x98] sm:$0xff]  ;;  %v212_v7 = vld [vmem:[#allocation8 + $0x90] sm:$0xff] }
  0x48   :  { %681 = vmatprep.subr.mxu0 %v92_v24  ;;  %584 = vmatpush3.msra.mxu1 %v200_v56  ;;  %v337_v3 = vld [vmem:[#allocation9 + $0x98] sm:$0xff]  ;;  %v336_v8 = vld [vmem:[#allocation9 + $0x90] sm:$0xff]  ;;  %v211_v11 = vld [vmem:[#allocation8 + $0x88] sm:$0xff] }
  0x49   :  { %682 = vmatpush3.msra.mxu0 %v92_v24  ;;  %585 = vmatprep.subr.mxu1 %v215_v58  ;;  %v197_v5 = vld [vmem:[#allocation8 + $0x18] sm:$0xff]  ;;  %v196_v9 = vld [vmem:[#allocation8 + $0x10] sm:$0xff]  ;;  %v335_v12 = vld [vmem:[#allocation9 + $0x88] sm:$0xff] }
  0x4a   :  { %683 = vmatprep.subr.mxu0 %v91_v25  ;;  %586 = vmatpush3.msra.mxu1 %v199_v60  ;;  %v321_v6 = vld [vmem:[#allocation9 + $0x18] sm:$0xff]  ;;  %v320_v10 = vld [vmem:[#allocation9 + $0x10] sm:$0xff]  ;;  %v195_v13 = vld [vmem:[#allocation8 + $0x8] sm:$0xff] }
  0x4b   :  { %684 = vmatpush3.msra.mxu0 %v91_v25  ;;  %587 = vmatprep.subr.mxu1 %v214_v62  ;;  %v319_v14 = vld [vmem:[#allocation9 + $0x8] sm:$0xff]  ;;  %v210_v15 = vld [vmem:[#allocation8 + $0x80] sm:$0xff]  ;;  %v365_v19 = vld [vmem:[#allocation9 + $0x178] sm:$0xff] }
  0x4c   :  { %685 = vmatprep.subr.mxu0 %v90_v26  ;;  %588 = vmatpush3.msra.mxu1 %v198_v0  ;;  %v334_v16 = vld [vmem:[#allocation9 + $0x80] sm:$0xff]  ;;  %v544_v21 = vld [vmem:[%s950_s2] ss:$0 sm:$0xff] }
  0x4d   :  { %686 = vmatpush3.msra.mxu0 %v90_v26  ;;  %589 = vmatprep.subr.mxu1 %v213_v2  ;;  %v194_v17 = vld [vmem:[#allocation8] sm:$0xff]  ;;  %v545_v42 = vld [vmem:[%s952_s4] ss:$0 sm:$0xff] }
  0x4e   :  { %687 = vmatprep.subr.mxu0 %v89_v27  ;;  %590 = vmatpush3.msra.mxu1 %v197_v5  ;;  %v318_v18 = vld [vmem:[#allocation9] sm:$0xff] }
  0x4f   :  { %688 = vmatpush3.msra.mxu0 %v89_v27  ;;  %591 = vmatprep.subr.mxu1 %v212_v7  ;;  %v364_v27 = vld [vmem:[#allocation9 + $0x170] sm:$0xff] }
  0x50   :  { %689 = vmatprep.subr.mxu0 %v88_v28  ;;  %592 = vmatpush3.msra.mxu1 %v196_v9 }
  0x51   :  { %690 = vmatpush3.msra.mxu0 %v88_v28  ;;  %593 = vmatprep.subr.mxu1 %v211_v11  ;;  %v363_v28 = vld [vmem:[#allocation9 + $0x168] sm:$0xff] }
  0x52   :  { %692 = vmatmul.mubr.f32.vlgmr.msra.gmra.mxu0 %v926_v29  ;;  %603 = vmatprep.subr.mxu0 %v349_v30  ;;  %v362_v30 = vld [vmem:[#allocation9 + $0x160] sm:$0xff] }
  0x53   :  { %604 = vmatpush3.msra.mxu0 %v333_v31  ;;  %594 = vmatpush3.msra.mxu1 %v195_v13  ;;  %v361_v31 = vld [vmem:[#allocation9 + $0x158] sm:$0xff] }
  0x54   :  { %605 = vmatprep.subr.mxu0 %v348_v32  ;;  %595 = vmatprep.subr.mxu1 %v210_v15  ;;  %v359_v32 = vld [vmem:[#allocation9 + $0x148] sm:$0xff] }
  0x55   :  { %606 = vmatpush3.msra.mxu0 %v332_v33  ;;  %596 = vmatpush3.msra.mxu1 %v194_v17  ;;  %v358_v33 = vld [vmem:[#allocation9 + $0x140] sm:$0xff] }
  0x56   :  { %607 = vmatprep.subr.mxu0 %v347_v34  ;;  %694 = vmatprep.subr.mxu1 %v365_v19  ;;  %v357_v34 = vld [vmem:[#allocation9 + $0x138] sm:$0xff] }
  0x57   :  { %608 = vmatpush3.msra.mxu0 %v331_v35  ;;  %v355_v35 = vld [vmem:[#allocation9 + $0x128] sm:$0xff] }
  0x58   :  { %609 = vmatprep.subr.mxu0 %v346_v36  ;;  %v354_v36 = vld [vmem:[#allocation9 + $0x120] sm:$0xff] }
  0x59   :  { %610 = vmatpush3.msra.mxu0 %v330_v37  ;;  %v353_v37 = vld [vmem:[#allocation9 + $0x118] sm:$0xff] }
  0x5a   :  { %611 = vmatprep.subr.mxu0 %v345_v38  ;;  %v352_v38 = vld [vmem:[#allocation9 + $0x110] sm:$0xff] }
  0x5b   :  { %612 = vmatpush3.msra.mxu0 %v329_v39  ;;  %v351_v39 = vld [vmem:[#allocation9 + $0x108] sm:$0xff] }
  0x5c   :  { %613 = vmatprep.subr.mxu0 %v344_v40  ;;  %v350_v40 = vld [vmem:[#allocation9 + $0x100] sm:$0xff] }
  0x5d   :  { %614 = vmatpush3.msra.mxu0 %v328_v41 }
  0x5e   :  { %615 = vmatprep.subr.mxu0 %v343_v43 }
  0x5f   :  { %616 = vmatpush3.msra.mxu0 %v327_v45 }
  0x60   :  { %617 = vmatprep.subr.mxu0 %v342_v47 }
  0x61   :  { %618 = vmatpush3.msra.mxu0 %v326_v49 }
  0x62   :  { %619 = vmatprep.subr.mxu0 %v341_v51 }
  0x63   :  { %620 = vmatpush3.msra.mxu0 %v325_v53 }
  0x64   :  { %621 = vmatprep.subr.mxu0 %v340_v55 }
  0x65   :  { %622 = vmatpush3.msra.mxu0 %v324_v57  ;;  %v546_v57 = vld [vmem:[%s954_s6] ss:$0 sm:$0xff] }
  0x66   :  { %623 = vmatprep.subr.mxu0 %v339_v59 }
  0x67   :  { %624 = vmatpush3.msra.mxu0 %v323_v61 }
  0x68   :  { %625 = vmatprep.subr.mxu0 %v338_v63 }
  0x69   :  { %626 = vmatpush3.msra.mxu0 %v322_v1 }
  0x6a   :  { %627 = vmatprep.subr.mxu0 %v337_v3 }
  0x6b   :  { %628 = vmatpush3.msra.mxu0 %v321_v6 }
  0x6c   :  { %629 = vmatprep.subr.mxu0 %v336_v8 }
  0x6d   :  { %630 = vmatpush3.msra.mxu0 %v320_v10 }
  0x6e   :  { %631 = vmatprep.subr.mxu0 %v335_v12 }
  0x6f   :  { %632 = vmatpush3.msra.mxu0 %v319_v14 }
  0x70   :  { %633 = vmatprep.subr.mxu0 %v334_v16 }
  0x71   :  { %634 = vmatpush3.msra.mxu0 %v318_v18 }
 0x112   :  { %v693_v20 = vpop.f32.mrf.mxu0 }
 0x113   :  { %v183_v23 = vadd.f32 %v693_v20, %v544_v21 }
 0x114   :  { %v177_v22 = vpop.f32.mrf.mxu0 }
 0x115   :  { %v178_v24 = vadd.f32 %v544_v21, %v177_v22 }
 0x117   :  { %736 = vtanh.f32 %v178_v24 }
 0x118   :  { %738 = vtanh.f32 %v183_v23 }
 0x124   :  { %v737_v25 = vpop.eup %736 }
 0x125   :  { %297 = vmatprep.mubr.f32.mxu1 %v737_v25  ;;  %437 = vmatprep.mubr.f32.mxu0 %v737_v25  ;;  %v739_v26 = vpop.eup %738 }
 0x126   :  { %298 = vmatmul.mubr.f32.vlgmr.msra.gmra.mxu1 %v923_v4  ;;  %438 = vmatmul.mubr.f32.vlgmr.msra.gmra.mxu0 %v923_v4  ;;  %v360_v4 = vld [vmem:[#allocation9 + $0x150] sm:$0xff] }
 0x127   :  { %302 = vmatprep.mubr.f32.mxu1 %v739_v26  ;;  %442 = vmatprep.mubr.f32.mxu0 %v739_v26 }
 0x128   :  { %695 = vmatpush3.msra.mxu1 %v365_v19 }
 0x129   :  { %696 = vmatprep.subr.mxu1 %v364_v27 }
 0x12a   :  { %303 = vmatmul.mubr.f32.gmra.mxu1 %v926_v29  ;;  %443 = vmatmul.mubr.f32.gmra.mxu0 %v926_v29  ;;  %v356_v29 = vld [vmem:[#allocation9 + $0x130] sm:$0xff] }
 0x12b   :  { %697 = vmatpush3.msra.mxu1 %v364_v27 }
 0x12c   :  { %698 = vmatprep.subr.mxu1 %v363_v28 }
 0x12d   :  { %699 = vmatpush3.msra.mxu1 %v363_v28 }
 0x12e   :  { %700 = vmatprep.subr.mxu1 %v362_v30 }
 0x12f   :  { %701 = vmatpush3.msra.mxu1 %v362_v30 }
 0x130   :  { %702 = vmatprep.subr.mxu1 %v361_v31 }
 0x131   :  { %703 = vmatpush3.msra.mxu1 %v361_v31 }
 0x132   :  { %704 = vmatprep.subr.mxu1 %v360_v4 }
 0x133   :  { %705 = vmatpush3.msra.mxu1 %v360_v4 }
 0x134   :  { %706 = vmatprep.subr.mxu1 %v359_v32 }
 0x135   :  { %707 = vmatpush3.msra.mxu1 %v359_v32 }
 0x136   :  { %708 = vmatprep.subr.mxu1 %v358_v33 }
 0x137   :  { %709 = vmatpush3.msra.mxu1 %v358_v33 }
 0x138   :  { %710 = vmatprep.subr.mxu1 %v357_v34 }
 0x139   :  { %711 = vmatpush3.msra.mxu1 %v357_v34 }
 0x13a   :  { %712 = vmatprep.subr.mxu1 %v356_v29 }
 0x13b   :  { %713 = vmatpush3.msra.mxu1 %v356_v29 }
 0x13c   :  { %714 = vmatprep.subr.mxu1 %v355_v35 }
 0x13d   :  { %715 = vmatpush3.msra.mxu1 %v355_v35 }
 0x13e   :  { %716 = vmatprep.subr.mxu1 %v354_v36 }
 0x13f   :  { %717 = vmatpush3.msra.mxu1 %v354_v36 }
 0x140   :  { %718 = vmatprep.subr.mxu1 %v353_v37 }
 0x141   :  { %719 = vmatpush3.msra.mxu1 %v353_v37 }
 0x142   :  { %720 = vmatprep.subr.mxu1 %v352_v38 }
 0x143   :  { %721 = vmatpush3.msra.mxu1 %v352_v38 }
 0x144   :  { %722 = vmatprep.subr.mxu1 %v351_v39 }
 0x145   :  { %723 = vmatpush3.msra.mxu1 %v351_v39 }
 0x146   :  { %724 = vmatprep.subr.mxu1 %v350_v40 }
 0x147   :  { %725 = vmatpush3.msra.mxu1 %v350_v40 }
 0x1e6   :  { %v597_v41 = vpop.f32.mrf.mxu1  ;;  %v635_v52 = vpop.f32.mrf.mxu0 }
 0x1e8   :  { %v598_v43 = vpop.f32.mrf.mxu1  ;;  %v636_v53 = vpop.f32.mrf.mxu0 }
 0x1e9   :  { %v599_v44 = vadd.f32 %v598_v43, %v597_v41  ;;  %v637_v58 = vadd.f32 %v636_v53, %v635_v52 }
 0x1ea   :  { %v600_v45 = vpop.f32.mrf.mxu1  ;;  %v638_v54 = vpop.f32.mrf.mxu0 }
 0x1eb   :  { %v300_v46 = vadd.f32 %v599_v44, %v545_v42  ;;  %v440_v62 = vadd.f32 %v637_v58, %v546_v57 }
 0x1ec   :  { %v601_v47 = vpop.f32.mrf.mxu1  ;;  %v639_v55 = vpop.f32.mrf.mxu0 }
 0x1ed   :  { %740 = vtanh.f32 %v300_v46  ;;  %v602_v48 = vadd.f32 %v601_v47, %v600_v45  ;;  %v640_v56 = vadd.f32 %v639_v55, %v638_v54 }
 0x1ef   :  { %v305_v49 = vadd.f32 %v602_v48, %v545_v42  ;;  %v445_v59 = vadd.f32 %v640_v56, %v546_v57 }
 0x1f1   :  { %742 = vtanh.f32 %v305_v49 }
 0x1fa   :  { %v741_v50 = vpop.eup %740 }
 0x1fb   :  { %726 = vmatprep.mubr.f32.mxu1 %v741_v50 }
 0x1fe   :  { %v743_v51 = vpop.eup %742 }
 0x1ff   :  { %727 = vmatmul.mubr.f32.vlgmr.msra.gmra.mxu1 %v743_v51 }
 0x2bf   :  { %v728_v60 = vpop.f32.mrf.mxu1 }
 0x2c0   :  { %v520_v61 = vadd.f32 %v728_v60, %v445_v59 }
 0x2c1   :  { %v514_v63 = vpop.f32.mrf.mxu1 }
 0x2c2   :  { %524 = vst [vmem:[#allocation11 + $0x8] sm:$0xff] %v520_v61  ;;  %v515_v0 = vadd.f32 %v514_v63, %v440_v62 }
 0x2c4   :  { %523 = vst [vmem:[#allocation11] sm:$0xff] %v515_v0 }
 0x2c5   :  { %835 = shalt.err (!%p832_p10)
}
 0x2c6   :  { %536 = dma.vmem_to_hbm [thread:$0]  %s531_s24, 256, %s955_s7, [#allocation5], %s854_s29, %s854_s29, %s855_s30  }
 0x2c7   :  { %850 = dma.done.wait [#allocation5], 256  }
 0x2c8   :  { %851 = vsyncadd [#allocation5], 4294967040 }
 0x2c9   :  { %540 = vsyncpa [#allocation4], 1 }
 0x2ca   :  { %541 = vsyncpa [#allocation7], 1 }
 0x2cb   :  { %542 = vsyncpa [#allocation10], 1 }
 0x2cc   :  { %543 = vsyncpa [#allocation5], 1 }

// kernel: tpu_custom_call.1
= control target key start
LH: loop header
LB: loop body
LE: loop exit
PB: predicated region body
PF: predicated region fallthrough
CT: control target
= control target key end

     0   :  { %12 = vsyncpa [#allocation4], 0  ;;  %s948_s0 = inlined_call_operand.hbm [shape: f32[16,128], index: 0, kind: input, shape index: {}]   ;;  %s949_s1 = inlined_call_operand.hbm [shape: f32[128,128], index: 1, kind: input, shape index: {}]   ;;  %s950_s2 = inlined_call_operand.vmem [shape: f32[1,128], index: 2, kind: input, shape index: {}]   ;;  %s951_s3 = inlined_call_operand.hbm [shape: f32[256,128], index: 3, kind: input, shape index: {}]   ;;  %s952_s4 = inlined_call_operand.vmem [shape: f32[1,128], index: 4, kind: input, shape index: {}]   ;;  %s953_s5 = inlined_call_operand.hbm [shape: f32[384,128], index: 5, kind: input, shape index: {}]   ;;  %s954_s6 = inlined_call_operand.vmem [shape: f32[1,128], index: 6, kind: input, shape index: {}]   ;;  %s955_s7 = inlined_call_operand.hbm [shape: f32[16,128], index: 7, kind: output, shape index: {}]  }
   0x1   :  { %13 = vsyncpa [#allocation7], 0 }
   0x2   :  { %14 = vsyncpa [#allocation10], 0 }
   0x3   :  { %15 = vsyncpa [#allocation5], 0  ;;  %s852_s24 = smov [#allocation6]   ;;  %s853_s26 = smov [#allocation3]  }
   0x4   :  { %s33_s25 = sshll.u32 %s852_s24, 4  ;;  %s21_s27 = sshll.u32 %s853_s26, 4  ;;  %s34_s25 = int_to_ptr.vmem [resolvable:$true] %s33_s25  ;;  %s22_s27 = int_to_ptr.vmem [resolvable:$true] %s21_s27 }
   0x5   :  { %s752_s28 = scalar_lea.vmem %s34_s25, 2048  ;;  %p757_p1 = scmp.lt.s32.totalorder %s34_s25, %s34_s25 }
   0x6   :  { %p753_p0 = scmp.ne.s32.totalorder %s34_s25, %s752_s28  ;;  %p758_p2 = scmp.lt.s32.totalorder %s752_s28, %s752_s28 }
   0x8   :  { %p759_p3 = por %p758_p2, %p757_p1 }
   0xa   :  { %p760_p4 = pnand %p759_p3, %p753_p0 }
   0xc   :  { %763 = shalt.err (!%p760_p4)
}
   0xd   :  { %s854_s29 = smov 128   ;;  %s855_s30 = smov 8  }
   0xe   :  { %39 = dma.hbm_to_vmem [thread:$0]  %s949_s1, 2048, %s34_s25, [#allocation7], %s854_s29, %s854_s29, %s855_s30  }
   0xf   :  { %s772_s10 = scalar_lea.vmem %s22_s27, 256  ;;  %p777_p6 = scmp.lt.s32.totalorder %s22_s27, %s22_s27 }
  0x10   :  { %p773_p5 = scmp.ne.s32.totalorder %s22_s27, %s772_s10  ;;  %p778_p7 = scmp.lt.s32.totalorder %s772_s10, %s772_s10 }
  0x12   :  { %p779_p8 = por %p778_p7, %p777_p6 }
  0x14   :  { %p780_p9 = pnand %p779_p8, %p773_p5 }
  0x16   :  { %783 = shalt.err (!%p780_p9)
}
  0x17   :  { %27 = dma.hbm_to_vmem [thread:$0]  %s948_s0, 256, %s22_s27, [#allocation4], %s854_s29, %s854_s29, %s855_s30  }
  0x18   :  { %s856_s13 = smov [#allocation8]   ;;  %s857_s15 = smov [#allocation9]  }
  0x19   :  { %s47_s14 = sshll.u32 %s856_s13, 4  ;;  %s61_s16 = sshll.u32 %s857_s15, 4  ;;  %s48_s14 = int_to_ptr.vmem [resolvable:$true] %s47_s14  ;;  %s62_s16 = int_to_ptr.vmem [resolvable:$true] %s61_s16 }
  0x1a   :  { %s792_s1 = scalar_lea.vmem %s48_s14, 4096  ;;  %p797_p11 = scmp.lt.s32.totalorder %s48_s14, %s48_s14 }
  0x1b   :  { %p793_p10 = scmp.ne.s32.totalorder %s48_s14, %s792_s1  ;;  %p798_p12 = scmp.lt.s32.totalorder %s792_s1, %s792_s1 }
  0x1d   :  { %p799_p13 = por %p798_p12, %p797_p11 }
  0x1f   :  { %p800_p0 = pnand %p799_p13, %p793_p10 }
  0x21   :  { %803 = shalt.err (!%p800_p0)
}
  0x22   :  { %53 = dma.hbm_to_vmem [thread:$0]  %s951_s3, 4096, %s48_s14, [#allocation7], %s854_s29, %s854_s29, %s855_s30  }
  0x23   :  { %s812_s0 = scalar_lea.vmem %s62_s16, 6144  ;;  %p817_p2 = scmp.lt.s32.totalorder %s62_s16, %s62_s16 }
  0x24   :  { %p813_p1 = scmp.ne.s32.totalorder %s62_s16, %s812_s0  ;;  %p818_p3 = scmp.lt.s32.totalorder %s812_s0, %s812_s0 }
  0x26   :  { %p819_p4 = por %p818_p3, %p817_p2 }
  0x28   :  { %p820_p5 = pnand %p819_p4, %p813_p1 }
  0x2a   :  { %823 = shalt.err (!%p820_p5)
}
  0x2b   :  { %67 = dma.hbm_to_vmem [thread:$0]  %s953_s5, 6144, %s62_s16, [#allocation10], %s854_s29, %s854_s29, %s855_s30  }
  0x2c   :  { %844 = dma.done.wait [#allocation4], 256  }
  0x2d   :  { %845 = vsyncadd [#allocation4], 4294967040 }
  0x2e   :  { %846 = dma.done.wait [#allocation7], 6144  }
  0x2f   :  { %847 = vsyncadd [#allocation7], 4294961152 }
  0x30   :  { %848 = dma.done.wait [#allocation10], 6144  }
  0x31   :  { %849 = vsyncadd [#allocation10], 4294961152  ;;  %v103_v0 = vld [vmem:[#allocation6 + $0x78] sm:$0xff]  ;;  %v102_v1 = vld [vmem:[#allocation6 + $0x70] sm:$0xff]  ;;  %s858_s23 = smov [#allocation11]  }
  0x32   :  { %659 = vmatprep.subr.mxu0 %v103_v0  ;;  %v101_v2 = vld [vmem:[#allocation6 + $0x68] sm:$0xff]  ;;  %v100_v3 = vld [vmem:[#allocation6 + $0x60] sm:$0xff]  ;;  %v923_v4 = vld [vmem:[#allocation3] sm:$0xff]  ;;  %s530_s24 = sshll.u32 %s858_s23, 4  ;;  %s531_s24 = int_to_ptr.vmem [resolvable:$true] %s530_s24 }
  0x33   :  { %660 = vmatpush3.msra.mxu0 %v103_v0  ;;  %v99_v5 = vld [vmem:[#allocation6 + $0x58] sm:$0xff]  ;;  %691 = vmatprep.mubr.f32.mxu0 %v923_v4  ;;  %v224_v8 = vld [vmem:[#allocation8 + $0xf0] sm:$0xff]  ;;  %v223_v11 = vld [vmem:[#allocation8 + $0xe8] sm:$0xff]  ;;  %s824_s25 = scalar_lea.vmem %s531_s24, 256  ;;  %p829_p7 = scmp.lt.s32.totalorder %s531_s24, %s531_s24 }
  0x34   :  { %661 = vmatprep.subr.mxu0 %v102_v1  ;;  %v225_v6 = vld [vmem:[#allocation8 + $0xf8] sm:$0xff]  ;;  %v98_v9 = vld [vmem:[#allocation6 + $0x50] sm:$0xff]  ;;  %v207_v12 = vld [vmem:[#allocation8 + $0x68] sm:$0xff]  ;;  %p825_p6 = scmp.ne.s32.totalorder %s531_s24, %s824_s25  ;;  %p830_p8 = scmp.lt.s32.totalorder %s824_s25, %s824_s25 }
  0x35   :  { %662 = vmatpush3.msra.mxu0 %v102_v1  ;;  %v209_v7 = vld [vmem:[#allocation8 + $0x78] sm:$0xff]  ;;  %565 = vmatprep.subr.mxu1 %v225_v6  ;;  %v208_v10 = vld [vmem:[#allocation8 + $0x70] sm:$0xff]  ;;  %v97_v13 = vld [vmem:[#allocation6 + $0x48] sm:$0xff] }
  0x36   :  { %663 = vmatprep.subr.mxu0 %v101_v2  ;;  %566 = vmatpush3.msra.mxu1 %v209_v7  ;;  %v222_v14 = vld [vmem:[#allocation8 + $0xe0] sm:$0xff]  ;;  %v221_v17 = vld [vmem:[#allocation8 + $0xd8] sm:$0xff]  ;;  %v220_v20 = vld [vmem:[#allocation8 + $0xd0] sm:$0xff]  ;;  %p831_p9 = por %p830_p8, %p829_p7 }
  0x37   :  { %664 = vmatpush3.msra.mxu0 %v101_v2  ;;  %567 = vmatprep.subr.mxu1 %v224_v8  ;;  %v206_v15 = vld [vmem:[#allocation8 + $0x60] sm:$0xff]  ;;  %v205_v18 = vld [vmem:[#allocation8 + $0x58] sm:$0xff]  ;;  %v204_v21 = vld [vmem:[#allocation8 + $0x50] sm:$0xff] }
  0x38   :  { %665 = vmatprep.subr.mxu0 %v100_v3  ;;  %568 = vmatpush3.msra.mxu1 %v208_v10  ;;  %v96_v16 = vld [vmem:[#allocation6 + $0x40] sm:$0xff]  ;;  %v95_v19 = vld [vmem:[#allocation6 + $0x38] sm:$0xff]  ;;  %v94_v22 = vld [vmem:[#allocation6 + $0x30] sm:$0xff]  ;;  %p832_p10 = pnand %p831_p9, %p825_p6 }
  0x39   :  { %666 = vmatpush3.msra.mxu0 %v100_v3  ;;  %569 = vmatprep.subr.mxu1 %v223_v11  ;;  %v93_v23 = vld [vmem:[#allocation6 + $0x28] sm:$0xff]  ;;  %v92_v24 = vld [vmem:[#allocation6 + $0x20] sm:$0xff]  ;;  %v91_v25 = vld [vmem:[#allocation6 + $0x18] sm:$0xff] }
  0x3a   :  { %667 = vmatprep.subr.mxu0 %v99_v5  ;;  %570 = vmatpush3.msra.mxu1 %v207_v12  ;;  %v90_v26 = vld [vmem:[#allocation6 + $0x10] sm:$0xff]  ;;  %v89_v27 = vld [vmem:[#allocation6 + $0x8] sm:$0xff]  ;;  %v88_v28 = vld [vmem:[#allocation6] sm:$0xff] }
  0x3b   :  { %668 = vmatpush3.msra.mxu0 %v99_v5  ;;  %571 = vmatprep.subr.mxu1 %v222_v14  ;;  %v926_v29 = vld [vmem:[#allocation3 + $0x8] sm:$0xff]  ;;  %v348_v32 = vld [vmem:[#allocation9 + $0xf0] sm:$0xff]  ;;  %v347_v34 = vld [vmem:[#allocation9 + $0xe8] sm:$0xff] }
  0x3c   :  { %669 = vmatprep.subr.mxu0 %v98_v9  ;;  %572 = vmatpush3.msra.mxu1 %v206_v15  ;;  %v349_v30 = vld [vmem:[#allocation9 + $0xf8] sm:$0xff]  ;;  %v332_v33 = vld [vmem:[#allocation9 + $0x70] sm:$0xff]  ;;  %v331_v35 = vld [vmem:[#allocation9 + $0x68] sm:$0xff] }
  0x3d   :  { %670 = vmatpush3.msra.mxu0 %v98_v9  ;;  %573 = vmatprep.subr.mxu1 %v221_v17  ;;  %v333_v31 = vld [vmem:[#allocation9 + $0x78] sm:$0xff]  ;;  %v346_v36 = vld [vmem:[#allocation9 + $0xe0] sm:$0xff]  ;;  %v344_v40 = vld [vmem:[#allocation9 + $0xd0] sm:$0xff] }
  0x3e   :  { %671 = vmatprep.subr.mxu0 %v97_v13  ;;  %574 = vmatpush3.msra.mxu1 %v205_v18  ;;  %v330_v37 = vld [vmem:[#allocation9 + $0x60] sm:$0xff]  ;;  %v345_v38 = vld [vmem:[#allocation9 + $0xd8] sm:$0xff]  ;;  %v328_v41 = vld [vmem:[#allocation9 + $0x50] sm:$0xff] }
  0x3f   :  { %672 = vmatpush3.msra.mxu0 %v97_v13  ;;  %575 = vmatprep.subr.mxu1 %v220_v20  ;;  %v329_v39 = vld [vmem:[#allocation9 + $0x58] sm:$0xff]  ;;  %v219_v42 = vld [vmem:[#allocation8 + $0xc8] sm:$0xff]  ;;  %v218_v46 = vld [vmem:[#allocation8 + $0xc0] sm:$0xff] }
  0x40   :  { %673 = vmatprep.subr.mxu0 %v96_v16  ;;  %576 = vmatpush3.msra.mxu1 %v204_v21  ;;  %v343_v43 = vld [vmem:[#allocation9 + $0xc8] sm:$0xff]  ;;  %v342_v47 = vld [vmem:[#allocation9 + $0xc0] sm:$0xff]  ;;  %v217_v50 = vld [vmem:[#allocation8 + $0xb8] sm:$0xff] }
  0x41   :  { %674 = vmatpush3.msra.mxu0 %v96_v16  ;;  %577 = vmatprep.subr.mxu1 %v219_v42  ;;  %v203_v44 = vld [vmem:[#allocation8 + $0x48] sm:$0xff]  ;;  %v202_v48 = vld [vmem:[#allocation8 + $0x40] sm:$0xff]  ;;  %v341_v51 = vld [vmem:[#allocation9 + $0xb8] sm:$0xff] }
  0x42   :  { %675 = vmatprep.subr.mxu0 %v95_v19  ;;  %v327_v45 = vld [vmem:[#allocation9 + $0x48] sm:$0xff]  ;;  %578 = vmatpush3.msra.mxu1 %v203_v44  ;;  %v326_v49 = vld [vmem:[#allocation9 + $0x40] sm:$0xff]  ;;  %v201_v52 = vld [vmem:[#allocation8 + $0x38] sm:$0xff] }
  0x43   :  { %676 = vmatpush3.msra.mxu0 %v95_v19  ;;  %579 = vmatprep.subr.mxu1 %v218_v46  ;;  %v325_v53 = vld [vmem:[#allocation9 + $0x38] sm:$0xff]  ;;  %v216_v54 = vld [vmem:[#allocation8 + $0xb0] sm:$0xff]  ;;  %v215_v58 = vld [vmem:[#allocation8 + $0xa8] sm:$0xff] }
  0x44   :  { %677 = vmatprep.subr.mxu0 %v94_v22  ;;  %580 = vmatpush3.msra.mxu1 %v202_v48  ;;  %v340_v55 = vld [vmem:[#allocation9 + $0xb0] sm:$0xff]  ;;  %v339_v59 = vld [vmem:[#allocation9 + $0xa8] sm:$0xff]  ;;  %v214_v62 = vld [vmem:[#allocation8 + $0xa0] sm:$0xff] }
  0x45   :  { %678 = vmatpush3.msra.mxu0 %v94_v22  ;;  %581 = vmatprep.subr.mxu1 %v217_v50  ;;  %v200_v56 = vld [vmem:[#allocation8 + $0x30] sm:$0xff]  ;;  %v199_v60 = vld [vmem:[#allocation8 + $0x28] sm:$0xff]  ;;  %v338_v63 = vld [vmem:[#allocation9 + $0xa0] sm:$0xff] }
  0x46   :  { %679 = vmatprep.subr.mxu0 %v93_v23  ;;  %582 = vmatpush3.msra.mxu1 %v201_v52  ;;  %v324_v57 = vld [vmem:[#allocation9 + $0x30] sm:$0xff]  ;;  %v323_v61 = vld [vmem:[#allocation9 + $0x28] sm:$0xff]  ;;  %v198_v0 = vld [vmem:[#allocation8 + $0x20] sm:$0xff] }
  0x47   :  { %680 = vmatpush3.msra.mxu0 %v93_v23  ;;  %583 = vmatprep.subr.mxu1 %v216_v54  ;;  %v322_v1 = vld [vmem:[#allocation9 + $0x20] sm:$0xff]  ;;  %v213_v2 = vld [vmem:[#allocation8 + $0x98] sm:$0xff]  ;;  %v212_v7 = vld [vmem:[#allocation8 + $0x90] sm:$0xff] }
  0x48   :  { %681 = vmatprep.subr.mxu0 %v92_v24  ;;  %584 = vmatpush3.msra.mxu1 %v200_v56  ;;  %v337_v3 = vld [vmem:[#allocation9 + $0x98] sm:$0xff]  ;;  %v336_v8 = vld [vmem:[#allocation9 + $0x90] sm:$0xff]  ;;  %v211_v11 = vld [vmem:[#allocation8 + $0x88] sm:$0xff] }
  0x49   :  { %682 = vmatpush3.msra.mxu0 %v92_v24  ;;  %585 = vmatprep.subr.mxu1 %v215_v58  ;;  %v197_v5 = vld [vmem:[#allocation8 + $0x18] sm:$0xff]  ;;  %v196_v9 = vld [vmem:[#allocation8 + $0x10] sm:$0xff]  ;;  %v335_v12 = vld [vmem:[#allocation9 + $0x88] sm:$0xff] }
  0x4a   :  { %683 = vmatprep.subr.mxu0 %v91_v25  ;;  %586 = vmatpush3.msra.mxu1 %v199_v60  ;;  %v321_v6 = vld [vmem:[#allocation9 + $0x18] sm:$0xff]  ;;  %v320_v10 = vld [vmem:[#allocation9 + $0x10] sm:$0xff]  ;;  %v195_v13 = vld [vmem:[#allocation8 + $0x8] sm:$0xff] }
  0x4b   :  { %684 = vmatpush3.msra.mxu0 %v91_v25  ;;  %587 = vmatprep.subr.mxu1 %v214_v62  ;;  %v319_v14 = vld [vmem:[#allocation9 + $0x8] sm:$0xff]  ;;  %v210_v15 = vld [vmem:[#allocation8 + $0x80] sm:$0xff]  ;;  %v365_v19 = vld [vmem:[#allocation9 + $0x178] sm:$0xff] }
  0x4c   :  { %685 = vmatprep.subr.mxu0 %v90_v26  ;;  %588 = vmatpush3.msra.mxu1 %v198_v0  ;;  %v334_v16 = vld [vmem:[#allocation9 + $0x80] sm:$0xff]  ;;  %v544_v21 = vld [vmem:[%s950_s2] ss:$0 sm:$0xff] }
  0x4d   :  { %686 = vmatpush3.msra.mxu0 %v90_v26  ;;  %589 = vmatprep.subr.mxu1 %v213_v2  ;;  %v194_v17 = vld [vmem:[#allocation8] sm:$0xff]  ;;  %v545_v42 = vld [vmem:[%s952_s4] ss:$0 sm:$0xff] }
  0x4e   :  { %687 = vmatprep.subr.mxu0 %v89_v27  ;;  %590 = vmatpush3.msra.mxu1 %v197_v5  ;;  %v318_v18 = vld [vmem:[#allocation9] sm:$0xff] }
  0x4f   :  { %688 = vmatpush3.msra.mxu0 %v89_v27  ;;  %591 = vmatprep.subr.mxu1 %v212_v7  ;;  %v364_v27 = vld [vmem:[#allocation9 + $0x170] sm:$0xff] }
  0x50   :  { %689 = vmatprep.subr.mxu0 %v88_v28  ;;  %592 = vmatpush3.msra.mxu1 %v196_v9 }
  0x51   :  { %690 = vmatpush3.msra.mxu0 %v88_v28  ;;  %593 = vmatprep.subr.mxu1 %v211_v11  ;;  %v363_v28 = vld [vmem:[#allocation9 + $0x168] sm:$0xff] }
  0x52   :  { %692 = vmatmul.mubr.f32.vlgmr.msra.gmra.mxu0 %v926_v29  ;;  %603 = vmatprep.subr.mxu0 %v349_v30  ;;  %v362_v30 = vld [vmem:[#allocation9 + $0x160] sm:$0xff] }
  0x53   :  { %604 = vmatpush3.msra.mxu0 %v333_v31  ;;  %594 = vmatpush3.msra.mxu1 %v195_v13  ;;  %v361_v31 = vld [vmem:[#allocation9 + $0x158] sm:$0xff] }
  0x54   :  { %605 = vmatprep.subr.mxu0 %v348_v32  ;;  %595 = vmatprep.subr.mxu1 %v210_v15  ;;  %v359_v32 = vld [vmem:[#allocation9 + $0x148] sm:$0xff] }
  0x55   :  { %606 = vmatpush3.msra.mxu0 %v332_v33  ;;  %596 = vmatpush3.msra.mxu1 %v194_v17  ;;  %v358_v33 = vld [vmem:[#allocation9 + $0x140] sm:$0xff] }
  0x56   :  { %607 = vmatprep.subr.mxu0 %v347_v34  ;;  %694 = vmatprep.subr.mxu1 %v365_v19  ;;  %v357_v34 = vld [vmem:[#allocation9 + $0x138] sm:$0xff] }
  0x57   :  { %608 = vmatpush3.msra.mxu0 %v331_v35  ;;  %v355_v35 = vld [vmem:[#allocation9 + $0x128] sm:$0xff] }
  0x58   :  { %609 = vmatprep.subr.mxu0 %v346_v36  ;;  %v354_v36 = vld [vmem:[#allocation9 + $0x120] sm:$0xff] }
  0x59   :  { %610 = vmatpush3.msra.mxu0 %v330_v37  ;;  %v353_v37 = vld [vmem:[#allocation9 + $0x118] sm:$0xff] }
  0x5a   :  { %611 = vmatprep.subr.mxu0 %v345_v38  ;;  %v352_v38 = vld [vmem:[#allocation9 + $0x110] sm:$0xff] }
  0x5b   :  { %612 = vmatpush3.msra.mxu0 %v329_v39  ;;  %v351_v39 = vld [vmem:[#allocation9 + $0x108] sm:$0xff] }
  0x5c   :  { %613 = vmatprep.subr.mxu0 %v344_v40  ;;  %v350_v40 = vld [vmem:[#allocation9 + $0x100] sm:$0xff] }
  0x5d   :  { %614 = vmatpush3.msra.mxu0 %v328_v41 }
  0x5e   :  { %615 = vmatprep.subr.mxu0 %v343_v43 }
  0x5f   :  { %616 = vmatpush3.msra.mxu0 %v327_v45 }
  0x60   :  { %617 = vmatprep.subr.mxu0 %v342_v47 }
  0x61   :  { %618 = vmatpush3.msra.mxu0 %v326_v49 }
  0x62   :  { %619 = vmatprep.subr.mxu0 %v341_v51 }
  0x63   :  { %620 = vmatpush3.msra.mxu0 %v325_v53 }
  0x64   :  { %621 = vmatprep.subr.mxu0 %v340_v55 }
  0x65   :  { %622 = vmatpush3.msra.mxu0 %v324_v57  ;;  %v546_v57 = vld [vmem:[%s954_s6] ss:$0 sm:$0xff] }
  0x66   :  { %623 = vmatprep.subr.mxu0 %v339_v59 }
  0x67   :  { %624 = vmatpush3.msra.mxu0 %v323_v61 }
  0x68   :  { %625 = vmatprep.subr.mxu0 %v338_v63 }
  0x69   :  { %626 = vmatpush3.msra.mxu0 %v322_v1 }
  0x6a   :  { %627 = vmatprep.subr.mxu0 %v337_v3 }
  0x6b   :  { %628 = vmatpush3.msra.mxu0 %v321_v6 }
  0x6c   :  { %629 = vmatprep.subr.mxu0 %v336_v8 }
  0x6d   :  { %630 = vmatpush3.msra.mxu0 %v320_v10 }
  0x6e   :  { %631 = vmatprep.subr.mxu0 %v335_v12 }
  0x6f   :  { %632 = vmatpush3.msra.mxu0 %v319_v14 }
  0x70   :  { %633 = vmatprep.subr.mxu0 %v334_v16 }
  0x71   :  { %634 = vmatpush3.msra.mxu0 %v318_v18 }
 0x112   :  { %v693_v20 = vpop.f32.mrf.mxu0 }
 0x113   :  { %v183_v23 = vadd.f32 %v693_v20, %v544_v21 }
 0x114   :  { %v177_v22 = vpop.f32.mrf.mxu0 }
 0x115   :  { %v178_v24 = vadd.f32 %v544_v21, %v177_v22 }
 0x117   :  { %736 = vtanh.f32 %v178_v24 }
 0x118   :  { %738 = vtanh.f32 %v183_v23 }
 0x124   :  { %v737_v25 = vpop.eup %736 }
 0x125   :  { %297 = vmatprep.mubr.f32.mxu1 %v737_v25  ;;  %437 = vmatprep.mubr.f32.mxu0 %v737_v25  ;;  %v739_v26 = vpop.eup %738 }
 0x126   :  { %298 = vmatmul.mubr.f32.vlgmr.msra.gmra.mxu1 %v923_v4  ;;  %438 = vmatmul.mubr.f32.vlgmr.msra.gmra.mxu0 %v923_v4  ;;  %v360_v4 = vld [vmem:[#allocation9 + $0x150] sm:$0xff] }
 0x127   :  { %302 = vmatprep.mubr.f32.mxu1 %v739_v26  ;;  %442 = vmatprep.mubr.f32.mxu0 %v739_v26 }
 0x128   :  { %695 = vmatpush3.msra.mxu1 %v365_v19 }
 0x129   :  { %696 = vmatprep.subr.mxu1 %v364_v27 }
 0x12a   :  { %303 = vmatmul.mubr.f32.gmra.mxu1 %v926_v29  ;;  %443 = vmatmul.mubr.f32.gmra.mxu0 %v926_v29  ;;  %v356_v29 = vld [vmem:[#allocation9 + $0x130] sm:$0xff] }
 0x12b   :  { %697 = vmatpush3.msra.mxu1 %v364_v27 }
 0x12c   :  { %698 = vmatprep.subr.mxu1 %v363_v28 }
 0x12d   :  { %699 = vmatpush3.msra.mxu1 %v363_v28 }
 0x12e   :  { %700 = vmatprep.subr.mxu1 %v362_v30 }
 0x12f   :  { %701 = vmatpush3.msra.mxu1 %v362_v30 }
 0x130   :  { %702 = vmatprep.subr.mxu1 %v361_v31 }
 0x131   :  { %703 = vmatpush3.msra.mxu1 %v361_v31 }
 0x132   :  { %704 = vmatprep.subr.mxu1 %v360_v4 }
 0x133   :  { %705 = vmatpush3.msra.mxu1 %v360_v4 }
 0x134   :  { %706 = vmatprep.subr.mxu1 %v359_v32 }
 0x135   :  { %707 = vmatpush3.msra.mxu1 %v359_v32 }
 0x136   :  { %708 = vmatprep.subr.mxu1 %v358_v33 }
 0x137   :  { %709 = vmatpush3.msra.mxu1 %v358_v33 }
 0x138   :  { %710 = vmatprep.subr.mxu1 %v357_v34 }
 0x139   :  { %711 = vmatpush3.msra.mxu1 %v357_v34 }
 0x13a   :  { %712 = vmatprep.subr.mxu1 %v356_v29 }
 0x13b   :  { %713 = vmatpush3.msra.mxu1 %v356_v29 }
 0x13c   :  { %714 = vmatprep.subr.mxu1 %v355_v35 }
 0x13d   :  { %715 = vmatpush3.msra.mxu1 %v355_v35 }
 0x13e   :  { %716 = vmatprep.subr.mxu1 %v354_v36 }
 0x13f   :  { %717 = vmatpush3.msra.mxu1 %v354_v36 }
 0x140   :  { %718 = vmatprep.subr.mxu1 %v353_v37 }
 0x141   :  { %719 = vmatpush3.msra.mxu1 %v353_v37 }
 0x142   :  { %720 = vmatprep.subr.mxu1 %v352_v38 }
 0x143   :  { %721 = vmatpush3.msra.mxu1 %v352_v38 }
 0x144   :  { %722 = vmatprep.subr.mxu1 %v351_v39 }
 0x145   :  { %723 = vmatpush3.msra.mxu1 %v351_v39 }
 0x146   :  { %724 = vmatprep.subr.mxu1 %v350_v40 }
 0x147   :  { %725 = vmatpush3.msra.mxu1 %v350_v40 }
 0x1e6   :  { %v597_v41 = vpop.f32.mrf.mxu1  ;;  %v635_v52 = vpop.f32.mrf.mxu0 }
 0x1e8   :  { %v598_v43 = vpop.f32.mrf.mxu1  ;;  %v636_v53 = vpop.f32.mrf.mxu0 }
 0x1e9   :  { %v599_v44 = vadd.f32 %v598_v43, %v597_v41  ;;  %v637_v58 = vadd.f32 %v636_v53, %v635_v52 }
 0x1ea   :  { %v600_v45 = vpop.f32.mrf.mxu1  ;;  %v638_v54 = vpop.f32.mrf.mxu0 }
 0x1eb   :  { %v300_v46 = vadd.f32 %v599_v44, %v545_v42  ;;  %v440_v62 = vadd.f32 %v637_v58, %v546_v57 }
 0x1ec   :  { %v601_v47 = vpop.f32.mrf.mxu1  ;;  %v639_v55 = vpop.f32.mrf.mxu0 }
 0x1ed   :  { %740 = vtanh.f32 %v300_v46  ;;  %v602_v48 = vadd.f32 %v601_v47, %v600_v45  ;;  %v640_v56 = vadd.f32 %v639_v55, %v638_v54 }
 0x1ef   :  { %v305_v49 = vadd.f32 %v602_v48, %v545_v42  ;;  %v445_v59 = vadd.f32 %v640_v56, %v546_v57 }
 0x1f1   :  { %742 = vtanh.f32 %v305_v49 }
 0x1fa   :  { %v741_v50 = vpop.eup %740 }
 0x1fb   :  { %726 = vmatprep.mubr.f32.mxu1 %v741_v50 }
 0x1fe   :  { %v743_v51 = vpop.eup %742 }
 0x1ff   :  { %727 = vmatmul.mubr.f32.vlgmr.msra.gmra.mxu1 %v743_v51 }
 0x2bf   :  { %v728_v60 = vpop.f32.mrf.mxu1 }
 0x2c0   :  { %v520_v61 = vadd.f32 %v728_v60, %v445_v59 }
 0x2c1   :  { %v514_v63 = vpop.f32.mrf.mxu1 }
 0x2c2   :  { %524 = vst [vmem:[#allocation11 + $0x8] sm:$0xff] %v520_v61  ;;  %v515_v0 = vadd.f32 %v514_v63, %v440_v62 }
 0x2c4   :  { %523 = vst [vmem:[#allocation11] sm:$0xff] %v515_v0 }
 0x2c5   :  { %835 = shalt.err (!%p832_p10)
}
 0x2c6   :  { %536 = dma.vmem_to_hbm [thread:$0]  %s531_s24, 256, %s955_s7, [#allocation5], %s854_s29, %s854_s29, %s855_s30  }
 0x2c7   :  { %850 = dma.done.wait [#allocation5], 256  }
 0x2c8   :  { %851 = vsyncadd [#allocation5], 4294967040 }
 0x2c9   :  { %540 = vsyncpa [#allocation4], 1 }
 0x2ca   :  { %541 = vsyncpa [#allocation7], 1 }
 0x2cb   :  { %542 = vsyncpa [#allocation10], 1 }
 0x2cc   :  { %543 = vsyncpa [#allocation5], 1 }

</bundles_post_ra>
